<compile_context>
chip_gen: v6e
topology: v6e:2x2x1
jax: 0.10.0
libtpu: 0.0.40
codegen_flags: <defaults>
</compile_context>

<pallas_src>
import jax
import jax.numpy as jnp
from jax import lax
from jax.experimental import pallas as pl
from jax.experimental.pallas import tpu as pltpu

NODES = 64            # logical hidden width of ActorU
HIDDEN_PAD = 128      # lane-dense padded hidden width
ACTION_SUBLANE = 8    # sublane padding for the transposed FC3 output rows


def _round_up(x, m):
    return (x + m - 1) // m * m


def actor_u_kernel(obs_ref, w1_ref, b1_ref, w2_ref, b2_ref, w3t_ref, b3t_ref,
                   out_ref):
    # Cast obs to bf16 in-kernel (avoids a separate HBM pass in the wrapper).
    obs = obs_ref[...].astype(jnp.bfloat16)

    # FC1 + ReLU   (bf16 MXU inputs, f32 accumulation, f32 elementwise path)
    h1 = jnp.dot(obs, w1_ref[...],
                 preferred_element_type=jnp.float32) + b1_ref[...]
    h1 = jnp.maximum(h1, 0.0)

    # FC2 + ReLU
    h2 = jnp.dot(h1.astype(jnp.bfloat16), w2_ref[...],
                 preferred_element_type=jnp.float32) + b2_ref[...]
    h2 = jnp.maximum(h2, 0.0)

    # FC3 + tanh, computed transposed:
    #   h3t[a, b] = sum_k w3t[a, k] * h2[b, k]
    # so the output tile is (a_pad, tb): tiny sublane dim, lane dim = tb
    # (large multiple of 128) -> unmasked lane-dense stores, ~16x less
    # writeback than a 128-lane-padded (tb, 128) output.
    h3t = lax.dot_general(
        w3t_ref[...], h2.astype(jnp.bfloat16),
        dimension_numbers=(((1,), (1,)), ((), ())),
        preferred_element_type=jnp.float32)
    out_ref[...] = jnp.tanh(h3t + b3t_ref[...]).astype(out_ref.dtype)


def actor_u_forward(obs, params, *, tile_b=4096):
    """obs: [B, dim_obs] float32. Returns [B, dim_action_u] float32."""
    B, dim_obs = obs.shape
    dim_action_u = params["dim_action_u"]
    a_pad = params["w3t"].shape[0]

    # Batch tiling:
    #  * tiny batches: single grid step, block = full (16-aligned) extent.
    #  * large batches: lane-aligned tiles (multiple of 128), and at least
    #    2 grid steps so both v7x TensorCores get work.
    b16 = _round_up(B, 16)
    tile_b = max(128, _round_up(tile_b, 128))
    if b16 < 2 * 128:
        n_steps, tb = 1, b16
    else:
        tb = min(tile_b, _round_up(pl.cdiv(b16, 2), 128))
        n_steps = pl.cdiv(b16, tb)
    b_pad = n_steps * tb
    if b_pad != B:
        obs = jnp.pad(obs, ((0, b_pad - B), (0, 0)))

    const = lambda shape: pl.BlockSpec(shape, lambda i: (0,) * len(shape))

    out_t = pl.pallas_call(
        actor_u_kernel,
        out_shape=jax.ShapeDtypeStruct((a_pad, b_pad), jnp.float32),
        grid=(n_steps,),
        in_specs=[
            pl.BlockSpec((tb, dim_obs), lambda i: (i, 0)),  # obs: batch-tiled stream
            const(params["w1"].shape),                      # weights/biases stay VMEM-resident
            const(params["b1"].shape),
            const(params["w2"].shape),
            const(params["b2"].shape),
            const(params["w3t"].shape),
            const(params["b3t"].shape),
        ],
        out_specs=pl.BlockSpec((a_pad, tb), lambda i: (0, i)),
        compiler_params=pltpu.CompilerParams(
            dimension_semantics=("parallel",)),
    )(obs, params["w1"], params["b1"], params["w2"], params["b2"],
      params["w3t"], params["b3t"])

    # Tiny (a_pad, b_pad) result: strip padding, transpose back to (B, A).
    return out_t[:dim_action_u, :B].T


def init_params(key, dim_observation, dim_action_u):
    """nn.Linear-style U(-1/sqrt(fan_in), 1/sqrt(fan_in)) init, padded for the
    lane-dense kernel layout:
      w1: [dim_obs, 128] bf16,  b1: [1, 128] f32
      w2: [128, 128]     bf16,  b2: [1, 128] f32
      w3t: [a_pad, 128]  bf16 (FC3 stored transposed), b3t: [a_pad, 1] f32
    Zero-padded hidden/action rows/cols stay inert through ReLU/tanh."""
    ks = jax.random.split(key, 6)
    a_pad = _round_up(max(dim_action_u, ACTION_SUBLANE), ACTION_SUBLANE)

    def linear(kw, kb, fan_in, fan_out):
        bound = 1.0 / jnp.sqrt(jnp.float32(fan_in))
        w = jax.random.uniform(kw, (fan_in, fan_out), jnp.float32,
                               minval=-bound, maxval=bound)
        b = jax.random.uniform(kb, (fan_out,), jnp.float32,
                               minval=-bound, maxval=bound)
        return w, b

    w1, b1 = linear(ks[0], ks[1], dim_observation, NODES)
    w2, b2 = linear(ks[2], ks[3], NODES, NODES)
    w3, b3 = linear(ks[4], ks[5], NODES, dim_action_u)

    w1p = jnp.pad(w1, ((0, 0), (0, HIDDEN_PAD - NODES))).astype(jnp.bfloat16)
    b1p = jnp.pad(b1.reshape(1, -1), ((0, 0), (0, HIDDEN_PAD - NODES)))
    w2p = jnp.pad(w2, ((0, HIDDEN_PAD - NODES),
                       (0, HIDDEN_PAD - NODES))).astype(jnp.bfloat16)
    b2p = jnp.pad(b2.reshape(1, -1), ((0, 0), (0, HIDDEN_PAD - NODES)))

    w3t = jnp.pad(w3.T, ((0, a_pad - dim_action_u),
                         (0, HIDDEN_PAD - NODES))).astype(jnp.bfloat16)
    b3t = jnp.pad(b3.reshape(-1, 1), ((0, a_pad - dim_action_u), (0, 0)))

    return dict(w1=w1p, b1=b1p, w2=w2p, b2=b2p, w3t=w3t, b3t=b3t,
                dim_action_u=dim_action_u)


def actor_u_reference_bf16(obs, p):
    """Reference matching the kernel's dtype path (bf16 matmul inputs,
    f32 accumulation) using the padded params."""
    h = jnp.dot(obs.astype(jnp.bfloat16), p["w1"],
                preferred_element_type=jnp.float32) + p["b1"]
    h = jnp.maximum(h, 0.0)
    h = jnp.dot(h.astype(jnp.bfloat16), p["w2"],
                preferred_element_type=jnp.float32) + p["b2"]
    h = jnp.maximum(h, 0.0)
    h3 = jnp.dot(h.astype(jnp.bfloat16), p["w3t"].T,
                 preferred_element_type=jnp.float32) + p["b3t"].T
    return jnp.tanh(h3)[:, :p["dim_action_u"]]


def actor_u_reference_f32(obs, p):
    """Pure-f32 reference of the original module math (padding stripped)."""
    da = p["dim_action_u"]
    w1 = p["w1"].astype(jnp.float32)[:, :NODES]
    b1 = p["b1"][:, :NODES]
    w2 = p["w2"].astype(jnp.float32)[:NODES, :NODES]
    b2 = p["b2"][:, :NODES]
    w3 = p["w3t"].astype(jnp.float32)[:da, :NODES].T
    b3 = p["b3t"][:da, 0]
    h = jnp.maximum(obs @ w1 + b1, 0.0)
    h = jnp.maximum(h @ w2 + b2, 0.0)
    return jnp.tanh(h @ w3 + b3)


if __name__ == "__main__":
    key = jax.random.PRNGKey(0)
    k_obs, k_params = jax.random.split(key)

    batch = 8
    dim_observation = 16
    dim_action_u = 4

    obs = jax.random.normal(k_obs, (batch, dim_observation), jnp.float32)
    params = init_params(k_params, dim_observation, dim_action_u)

    out = actor_u_forward(obs, params)
    out = jax.block_until_ready(out)
    assert out.shape == (batch, dim_action_u)

    # Strict check vs a reference following the kernel's bf16/f32 path.
    ref_exact = actor_u_reference_bf16(obs, params)
    assert jnp.allclose(out, ref_exact, atol=2e-4, rtol=2e-4), (
        jnp.max(jnp.abs(out - ref_exact)))

    # Loose check vs the original all-f32 module math (bf16 rounding only).
    ref_f32 = actor_u_reference_f32(obs, params)
    assert jnp.allclose(out, ref_f32, atol=3e-2, rtol=3e-2), (
        jnp.max(jnp.abs(out - ref_f32)))

    print("KERNEL_OK")
</pallas_src>

<mosaic_0001>
module attributes {stable_mosaic.version = 11 : i64} {
  func.func @actor_u_kernel(%arg0: i32, %arg1: memref<16x16xf32, #tpu.memory_space<vmem>>, %arg2: memref<16x128xbf16, #tpu.memory_space<vmem>>, %arg3: memref<1x128xf32, #tpu.memory_space<vmem>>, %arg4: memref<128x128xbf16, #tpu.memory_space<vmem>>, %arg5: memref<1x128xf32, #tpu.memory_space<vmem>>, %arg6: memref<8x128xbf16, #tpu.memory_space<vmem>>, %arg7: memref<8x1xf32, #tpu.memory_space<vmem>>, %arg8: memref<8x16xf32, #tpu.memory_space<vmem>>) attributes {dimension_semantics = [#tpu.dimension_semantics<parallel>], iteration_bounds = array<i64: 1>, scalar_prefetch = 0 : i64, scratch_operands = 0 : i64, tpu.core_type = #tpu.core_type<tc>, window_params = [{transform_indices = @transform_0, window_bounds = array<i64: 16, 16>}, {pipeline_mode = #tpu.pipeline_mode<synchronous>, transform_indices = @transform_1, window_bounds = array<i64: 16, 128>}, {pipeline_mode = #tpu.pipeline_mode<synchronous>, transform_indices = @transform_2, window_bounds = array<i64: 1, 128>}, {pipeline_mode = #tpu.pipeline_mode<synchronous>, transform_indices = @transform_3, window_bounds = array<i64: 128, 128>}, {pipeline_mode = #tpu.pipeline_mode<synchronous>, transform_indices = @transform_4, window_bounds = array<i64: 1, 128>}, {pipeline_mode = #tpu.pipeline_mode<synchronous>, transform_indices = @transform_5, window_bounds = array<i64: 8, 128>}, {pipeline_mode = #tpu.pipeline_mode<synchronous>, transform_indices = @transform_6, window_bounds = array<i64: 8, 1>}, {transform_indices = @transform_7, window_bounds = array<i64: 8, 16>}]} {
    %c0 = arith.constant 0 : index
    %c0_0 = arith.constant 0 : index
    %0 = vector.load %arg1[%c0, %c0_0] : memref<16x16xf32, #tpu.memory_space<vmem>>, vector<16x16xf32>
    %1 = arith.truncf %0 : vector<16x16xf32> to vector<16x16xbf16>
    %c0_1 = arith.constant 0 : index
    %c0_2 = arith.constant 0 : index
    %2 = vector.load %arg2[%c0_1, %c0_2] : memref<16x128xbf16, #tpu.memory_space<vmem>>, vector<16x128xbf16>
    %cst = arith.constant dense<0.000000e+00> : vector<16x128xf32>
    %3 = tpu.matmul %1, %2, %cst {dimension_numbers = #tpu.dot_dimension_numbers<[1], [0], [0], [1], [0, 0, 1, 1], [], []>} : vector<16x16xbf16>, vector<16x128xbf16>, vector<16x128xf32> -> vector<16x128xf32>
    %c0_3 = arith.constant 0 : index
    %c0_4 = arith.constant 0 : index
    %4 = vector.load %arg3[%c0_3, %c0_4] : memref<1x128xf32, #tpu.memory_space<vmem>>, vector<1x128xf32>
    %5 = vector.broadcast %4 : vector<1x128xf32> to vector<16x128xf32>
    %6 = arith.addf %3, %5 : vector<16x128xf32>
    %cst_5 = arith.constant 0.000000e+00 : f32
    %7 = vector.broadcast %cst_5 : f32 to vector<16x128xf32>
    %8 = arith.maximumf %6, %7 : vector<16x128xf32>
    %9 = arith.truncf %8 : vector<16x128xf32> to vector<16x128xbf16>
    %c0_6 = arith.constant 0 : index
    %c0_7 = arith.constant 0 : index
    %10 = vector.load %arg4[%c0_6, %c0_7] : memref<128x128xbf16, #tpu.memory_space<vmem>>, vector<128x128xbf16>
    %cst_8 = arith.constant dense<0.000000e+00> : vector<16x128xf32>
    %11 = tpu.matmul %9, %10, %cst_8 {dimension_numbers = #tpu.dot_dimension_numbers<[1], [0], [0], [1], [0, 0, 1, 1], [], []>} : vector<16x128xbf16>, vector<128x128xbf16>, vector<16x128xf32> -> vector<16x128xf32>
    %c0_9 = arith.constant 0 : index
    %c0_10 = arith.constant 0 : index
    %12 = vector.load %arg5[%c0_9, %c0_10] : memref<1x128xf32, #tpu.memory_space<vmem>>, vector<1x128xf32>
    %13 = vector.broadcast %12 : vector<1x128xf32> to vector<16x128xf32>
    %14 = arith.addf %11, %13 : vector<16x128xf32>
    %cst_11 = arith.constant 0.000000e+00 : f32
    %15 = vector.broadcast %cst_11 : f32 to vector<16x128xf32>
    %16 = arith.maximumf %14, %15 : vector<16x128xf32>
    %c0_12 = arith.constant 0 : index
    %c0_13 = arith.constant 0 : index
    %17 = vector.load %arg6[%c0_12, %c0_13] : memref<8x128xbf16, #tpu.memory_space<vmem>>, vector<8x128xbf16>
    %18 = arith.truncf %16 : vector<16x128xf32> to vector<16x128xbf16>
    %cst_14 = arith.constant dense<0.000000e+00> : vector<8x16xf32>
    %19 = tpu.matmul %17, %18, %cst_14 {dimension_numbers = #tpu.dot_dimension_numbers<[1], [1], [0], [0], [0, 0, 1, 0], [], []>} : vector<8x128xbf16>, vector<16x128xbf16>, vector<8x16xf32> -> vector<8x16xf32>
    %c0_15 = arith.constant 0 : index
    %c0_16 = arith.constant 0 : index
    %20 = vector.load %arg7[%c0_15, %c0_16] : memref<8x1xf32, #tpu.memory_space<vmem>>, vector<8x1xf32>
    %21 = vector.broadcast %20 : vector<8x1xf32> to vector<8x16xf32>
    %22 = arith.addf %19, %21 : vector<8x16xf32>
    %23 = math.tanh %22 : vector<8x16xf32>
    %c0_17 = arith.constant 0 : index
    %c0_18 = arith.constant 0 : index
    %24 = vector.load %arg8[%c0_17, %c0_18] : memref<8x16xf32, #tpu.memory_space<vmem>>, vector<8x16xf32>
    tpu.vector_store %arg8[%c0_17, %c0_18], %23 {strides = array<i32>} : memref<8x16xf32, #tpu.memory_space<vmem>>, vector<8x16xf32>,
    return
  }
  func.func @transform_0(%arg0: i32) -> (i32, i32) {
    %c0_i32 = arith.constant 0 : i32
    %c0_i32_0 = arith.constant 0 : i32
    return %arg0, %c0_i32 : i32, i32
  }
  func.func @transform_1(%arg0: i32) -> (i32, i32) {
    %c0_i32 = arith.constant 0 : i32
    %c0_i32_0 = arith.constant 0 : i32
    %c0_i32_1 = arith.constant 0 : i32
    return %c0_i32, %c0_i32_0 : i32, i32
  }
  func.func @transform_2(%arg0: i32) -> (i32, i32) {
    %c0_i32 = arith.constant 0 : i32
    %c0_i32_0 = arith.constant 0 : i32
    %c0_i32_1 = arith.constant 0 : i32
    return %c0_i32, %c0_i32_0 : i32, i32
  }
  func.func @transform_3(%arg0: i32) -> (i32, i32) {
    %c0_i32 = arith.constant 0 : i32
    %c0_i32_0 = arith.constant 0 : i32
    %c0_i32_1 = arith.constant 0 : i32
    return %c0_i32, %c0_i32_0 : i32, i32
  }
  func.func @transform_4(%arg0: i32) -> (i32, i32) {
    %c0_i32 = arith.constant 0 : i32
    %c0_i32_0 = arith.constant 0 : i32
    %c0_i32_1 = arith.constant 0 : i32
    return %c0_i32, %c0_i32_0 : i32, i32
  }
  func.func @transform_5(%arg0: i32) -> (i32, i32) {
    %c0_i32 = arith.constant 0 : i32
    %c0_i32_0 = arith.constant 0 : i32
    %c0_i32_1 = arith.constant 0 : i32
    return %c0_i32, %c0_i32_0 : i32, i32
  }
  func.func @transform_6(%arg0: i32) -> (i32, i32) {
    %c0_i32 = arith.constant 0 : i32
    %c0_i32_0 = arith.constant 0 : i32
    %c0_i32_1 = arith.constant 0 : i32
    return %c0_i32, %c0_i32_0 : i32, i32
  }
  func.func @transform_7(%arg0: i32) -> (i32, i32) {
    %c0_i32 = arith.constant 0 : i32
    %c0_i32_0 = arith.constant 0 : i32
    return %c0_i32, %arg0 : i32, i32
  }
}

</mosaic_0001>

<bundles_post_ra>
// kernel: tpu_custom_call.1
= control target key start
LH: loop header
LB: loop body
LE: loop exit
PB: predicated region body
PF: predicated region fallthrough
CT: control target
= control target key end

     0   :  { %12 = vsyncpa [#allocation3], 0  ;;  %s559_s0 = inlined_call_operand.hbm [shape: f32[16,16], index: 0, kind: input, shape index: {}]   ;;  %s560_s1 = inlined_call_operand.vmem [shape: bf16[16,128], index: 1, kind: input, shape index: {}]   ;;  %s561_s2 = inlined_call_operand.hbm [shape: f32[1,128], index: 2, kind: input, shape index: {}]   ;;  %s562_s3 = inlined_call_operand.hbm [shape: bf16[128,128], index: 3, kind: input, shape index: {}]   ;;  %s563_s4 = inlined_call_operand.vmem [shape: f32[1,128], index: 4, kind: input, shape index: {}]   ;;  %s564_s5 = inlined_call_operand.vmem [shape: bf16[8,128], index: 5, kind: input, shape index: {}]   ;;  %s565_s6 = inlined_call_operand.vmem [shape: f32[8,1], index: 6, kind: input, shape index: {}]   ;;  %s566_s7 = inlined_call_operand.hbm [shape: f32[8,16], index: 7, kind: output, shape index: {}]  }
   0x1   :  { %13 = vsyncpa [#allocation6], 0 }
   0x2   :  { %14 = vsyncpa [#allocation4], 0  ;;  %s479_s24 = smov [#allocation5]   ;;  %s480_s26 = smov [#allocation2]  }
   0x3   :  { %s35_s25 = sshll.u32 %s479_s24, 4  ;;  %s20_s27 = sshll.u32 %s480_s26, 4  ;;  %s36_s25 = int_to_ptr.vmem [resolvable:$true] %s35_s25  ;;  %s21_s27 = int_to_ptr.vmem [resolvable:$true] %s20_s27 }
   0x4   :  { %s401_s28 = scalar_lea.vmem %s36_s25, 16  ;;  %s405_s29 = scalar_lea.vmem %s36_s25, 32 }
   0x5   :  { %p402_p0 = scmp.ne.s32.totalorder %s36_s25, %s401_s28  ;;  %p406_p1 = scmp.lt.s32.totalorder %s36_s25, %s36_s25 }
   0x6   :  { %p407_p2 = scmp.lt.s32.totalorder %s405_s29, %s401_s28 }
   0x8   :  { %p408_p3 = por %p407_p2, %p406_p1 }
   0xa   :  { %p409_p4 = pnand %p408_p3, %p402_p0 }
   0xc   :  { %412 = shalt.err (!%p409_p4)
}
   0xd   :  { %38 = dma.hbm_to_vmem [thread:$0]  %s561_s2, 16, %s36_s25, [#allocation6]  }
   0xe   :  { %s421_s9 = scalar_lea.vmem %s21_s27, 256  ;;  %p426_p6 = scmp.lt.s32.totalorder %s21_s27, %s21_s27 }
   0xf   :  { %p422_p5 = scmp.ne.s32.totalorder %s21_s27, %s421_s9  ;;  %p427_p7 = scmp.lt.s32.totalorder %s421_s9, %s421_s9 }
  0x11   :  { %p428_p8 = por %p427_p7, %p426_p6 }
  0x13   :  { %p429_p9 = pnand %p428_p8, %p422_p5 }
  0x15   :  { %432 = shalt.err (!%p429_p9)
}
  0x16   :  { %s481_s10 = smov 128   ;;  %s482_s11 = smov 8  }
  0x17   :  { %26 = dma.hbm_to_vmem [thread:$0]  %s559_s0, 256, %s21_s27, [#allocation3], %s481_s10, %s481_s10, %s482_s11  }
  0x18   :  { %s483_s14 = smov [#allocation7]  }
  0x19   :  { %s44_s15 = sshll.u32 %s483_s14, 4  ;;  %s45_s15 = int_to_ptr.vmem [resolvable:$true] %s44_s15 }
  0x1a   :  { %s441_s16 = scalar_lea.vmem %s45_s15, 1024  ;;  %p446_p11 = scmp.lt.s32.totalorder %s45_s15, %s45_s15 }
  0x1b   :  { %p442_p10 = scmp.ne.s32.totalorder %s45_s15, %s441_s16  ;;  %p447_p12 = scmp.lt.s32.totalorder %s441_s16, %s441_s16 }
  0x1d   :  { %p448_p13 = por %p447_p12, %p446_p11 }
  0x1f   :  { %p449_p0 = pnand %p448_p13, %p442_p10 }
  0x21   :  { %452 = shalt.err (!%p449_p0)
}
  0x22   :  { %s484_s2 = smov 64   ;;  %s485_s17 = smov 4  }
  0x23   :  { %50 = dma.hbm_to_vmem [thread:$0]  %s562_s3, 1024, %s45_s15, [#allocation6], %s484_s2, %s484_s2, %s485_s17  }
  0x24   :  { %473 = dma.done.wait [#allocation3], 256  }
  0x25   :  { %474 = vsyncadd [#allocation3], 4294967040 }
  0x26   :  { %475 = dma.done.wait [#allocation6], 1040  }
  0x27   :  { %476 = vsyncadd [#allocation6], 4294966256  ;;  %v486_v0 = vmov 0.0   ;;  %vm487_vm0 = vmmov 0   ;;  %v382_v1 = vld [vmem:[%s560_s1] sm:$0xff]   ;;  %v68_v3 = vld [vmem:[#allocation2 + $0x8] sm:$0xff] }
  0x28   :  { %338 = vmatprep.subr.bf16.mxu0 %v486_v0  ;;  %340 = vmatprep.mubr.msk.bf16.mxu0 %vm487_vm0, %v486_v0  ;;  %v67_v2 = vld [vmem:[#allocation2] sm:$0xff]  ;;  %vm85_vm1 = vcmask 130048   ;;  %v383_v5 = vld [vmem:[#allocation7 + $0x38] sm:$0xff]   ;;  %v386_v8 = vld [vmem:[#allocation7 + $0x20] sm:$0xff]   ;;  %v488_v24 = vmov 0  }
  0x29   :  { %344 = vmatprep.subr.bf16.mxu1 %v486_v0  ;;  %360 = vmatprep.mubr.msk.bf16.mxu1 %vm487_vm0, %v486_v0  ;;  %v69_v4 = vpack.c.bf16 %v68_v3, %v67_v2  ;;  %v384_v6 = vld [vmem:[#allocation7 + $0x30] sm:$0xff]   ;;  %v385_v7 = vld [vmem:[#allocation7 + $0x28] sm:$0xff]   ;;  %v387_v9 = vld [vmem:[#allocation7 + $0x18] sm:$0xff]  }
  0x2a   :  { %339 = vmatpush3.bf16.msra.mxu0 %v382_v1  ;;  %345 = vmatpush3.bf16.msra.mxu1 %v383_v5  ;;  %v388_v10 = vld [vmem:[#allocation7 + $0x10] sm:$0xff]   ;;  %v389_v11 = vld [vmem:[#allocation7 + $0x8] sm:$0xff]   ;;  %v390_v12 = vld [vmem:[#allocation7] sm:$0xff]  }
  0x2b   :  { %364 = vmatprep.subr.bf16.mxu0 %v486_v0  ;;  %346 = vmatprep.subr.bf16.mxu1 %v486_v0  ;;  %v313_v13 = vld [vmem:[#allocation5] ss:$0 sm:$0xff]  ;;  %v249_v23 = vld [vmem:[%s565_s6] sm:$0xff] }
  0x2c   :  { %381 = vset.pattern.permute.xlu0 %v488_v24  ;;  %v316_v25 = vld [vmem:[%s563_s4] ss:$0 sm:$0xff]  ;;  %s489_s4 = smov [#allocation8]  }
  0x2d   :  { %341 = vmatmul.mubr.msk.bf16.vlgmr.msra.gmra.mxu0 %vm85_vm1, %v69_v4  ;;  %252 = vperm.xlu0 %381, %v249_v23   ;;  %v247_v35 = vld [vmem:[%s564_s5] sm:$0xf]  ;;  %s303_s6 = sshll.u32 %s489_s4, 4  ;;  %s304_s6 = int_to_ptr.vmem [resolvable:$true] %s303_s6 }
  0x2e   :  { %366 = vmatprep.mubr.msk.bf16.mxu0 %vm487_vm0, %v486_v0  ;;  %347 = vmatpush3.bf16.msra.mxu1 %v384_v6  ;;  %s453_s25 = scalar_lea.vmem %s304_s6, 128  ;;  %p458_p2 = scmp.lt.s32.totalorder %s304_s6, %s304_s6 }
  0x2f   :  { %348 = vmatprep.subr.bf16.mxu1 %v486_v0  ;;  %p454_p1 = scmp.ne.s32.totalorder %s304_s6, %s453_s25  ;;  %p459_p3 = scmp.lt.s32.totalorder %s453_s25, %s453_s25 }
  0x31   :  { %p460_p4 = por %p459_p3, %p458_p2 }
  0x32   :  { %349 = vmatpush3.bf16.msra.mxu1 %v385_v7 }
  0x33   :  { %350 = vmatprep.subr.bf16.mxu1 %v486_v0  ;;  %p461_p5 = pnand %p460_p4, %p454_p1 }
  0x36   :  { %351 = vmatpush3.bf16.msra.mxu1 %v386_v8 }
  0x37   :  { %352 = vmatprep.subr.bf16.mxu1 %v486_v0 }
  0x3a   :  { %353 = vmatpush3.bf16.msra.mxu1 %v387_v9 }
  0x3b   :  { %354 = vmatprep.subr.bf16.mxu1 %v486_v0 }
  0x3e   :  { %355 = vmatpush3.bf16.msra.mxu1 %v388_v10 }
  0x3f   :  { %356 = vmatprep.subr.bf16.mxu1 %v486_v0 }
  0x42   :  { %357 = vmatpush3.bf16.msra.mxu1 %v389_v11 }
  0x43   :  { %358 = vmatprep.subr.bf16.mxu1 %v486_v0 }
  0x46   :  { %359 = vmatpush3.bf16.msra.mxu1 %v390_v12 }
  0xa8   :  { %v253_v36 = vpop.permute.xlu0 %252 }
  0xed   :  { %v123_v14 = vpop.f32.mrf.mxu0 }
  0xee   :  { %v124_v16 = vadd.f32 %v313_v13, %v123_v14 }
  0xef   :  { %v342_v15 = vpop.f32.mrf.mxu0 }
  0xf0   :  { %v130_v20 = vmax.f32 %v124_v16, 0.0 }
  0xf1   :  { %v126_v17 = vpop.f32.mrf.mxu0 }
  0xf2   :  { %v127_v18 = vadd.f32 %v313_v13, %v126_v17 }
  0xf3   :  { %v343_v19 = vpop.f32.mrf.mxu0 }
  0xf4   :  { %v131_v21 = vmax.f32 %v127_v18, 0.0 }
  0xf6   :  { %v132_v22 = vpack.c.bf16 %v131_v21, %v130_v20 }
  0xf8   :  { %361 = vmatmul.mubr.bf16.vlgmr.msra.gmra.mxu1 %v132_v22 }
 0x1b8   :  { %v238_v26 = vpop.f32.mrf.mxu1 }
 0x1b9   :  { %v239_v28 = vadd.f32 %v316_v25, %v238_v26 }
 0x1ba   :  { %v362_v27 = vpop.f32.mrf.mxu1 }
 0x1bb   :  { %v245_v32 = vmax.f32 %v239_v28, 0.0 }
 0x1bc   :  { %v241_v29 = vpop.f32.mrf.mxu1 }
 0x1bd   :  { %v242_v30 = vadd.f32 %v316_v25, %v241_v29 }
 0x1be   :  { %v363_v31 = vpop.f32.mrf.mxu1 }
 0x1bf   :  { %v246_v33 = vmax.f32 %v242_v30, 0.0 }
 0x1c1   :  { %v248_v34 = vpack.c.bf16 %v246_v33, %v245_v32 }
 0x1c3   :  { %365 = vmatpush3.bf16.xpose.msra.mxu0 %v248_v34 }
 0x1ca   :  { %367 = vmatmul.mubr.bf16.vlgmr.msra.gmra.mxu0 %v247_v35 }
 0x28a   :  { %v289_v37 = vpop.f32.mrf.mxu0 }
 0x28b   :  { %v290_v38 = vadd.f32 %v289_v37, %v253_v36 }
 0x28c   :  { %v368_v39 = vpop.f32.mrf.mxu0 }
 0x28d   :  { %391 = vtanh.f32 %v290_v38 }
 0x28e   :  { %v292_v40 = vpop.f32.mrf.mxu0 }
 0x290   :  { %v369_v41 = vpop.f32.mrf.mxu0 }
 0x29a   :  { %v392_v42 = vpop.eup %391 }
 0x29b   :  { %296 = vst.msk [vmem:[#allocation8] sm:$0xff] %vm85_vm1, %v392_v42 }
 0x29c   :  { %464 = shalt.err (!%p461_p5)
}
 0x29d   :  { %306 = dma.vmem_to_hbm [thread:$0]  %s304_s6, 128, %s566_s7, [#allocation4]  }
 0x29e   :  { %477 = dma.done.wait [#allocation4], 128  }
 0x29f   :  { %478 = vsyncadd [#allocation4], 4294967168 }
 0x2a0   :  { %310 = vsyncpa [#allocation3], 1 }
 0x2a1   :  { %311 = vsyncpa [#allocation6], 1 }
 0x2a2   :  { %312 = vsyncpa [#allocation4], 1 }

</bundles_post_ra>
